<compile_context>
chip_gen: v7x
topology: tpu7x:2x2x1
jax: 0.10.0
libtpu: 0.0.40
codegen_flags: <defaults>
</compile_context>

<pallas_src>
import jax
import jax.numpy as jnp
from jax.experimental import pallas as pl
from jax.experimental.pallas import tpu as pltpu


def _addcoords_kernel(x_ref, coord_ref, o_ref):
    # x_ref:     (bb, C,        XY)  input channels (lane-dense)
    # coord_ref: (1,  n_coord,  XY)  precomputed coordinate channels (shared)
    # o_ref:     (bb, C+n_coord, XY)
    bb, c, xy = x_ref.shape
    n_coord = coord_ref.shape[1]

    # Pass-through copy of the input channels (single dense store).
    o_ref[:, :c, :] = x_ref[...]
    # Replicate the coordinate channels across the batch-block dim.
    o_ref[:, c:, :] = jnp.broadcast_to(coord_ref[...], (bb, n_coord, xy))


def addcoords_forward(x, with_r: bool = False):
    """x: (B, C, X, Y) -> (B, C+2(+1), X, Y), matching AddCoords.forward."""
    b, c, xd, yd = x.shape
    dtype = x.dtype
    n_coord = 3 if with_r else 2
    c_out = c + n_coord
    xy = xd * yd

    # Coordinate-channel table: independent of batch and channels, built once.
    sx = (2.0 / (xd - 1)) if xd > 1 else float("nan")
    sy = (2.0 / (yd - 1)) if yd > 1 else float("nan")
    xx = jnp.broadcast_to(
        (jnp.arange(xd, dtype=jnp.float32) * sx - 1.0)[:, None], (xd, yd)
    ).astype(dtype)
    yy = jnp.broadcast_to(
        (jnp.arange(yd, dtype=jnp.float32) * sy - 1.0)[None, :], (xd, yd)
    ).astype(dtype)
    chans = [xx, yy]
    if with_r:
        chans.append(jnp.sqrt((xx - 0.5) ** 2 + (yy - 0.5) ** 2).astype(dtype))
    coords = jnp.stack(chans, axis=0).reshape(1, n_coord, xy)

    # Lane-dense view of the input / output (reshape is free in XLA).
    x_flat = x.reshape(b, c, xy)

    # Pack several batch elements per grid step, within a modest VMEM budget.
    per_batch_bytes = c_out * xy * jnp.dtype(dtype).itemsize
    budget = 2 * 1024 * 1024
    bb = 1
    for cand in range(b, 0, -1):
        if b % cand == 0 and cand * per_batch_bytes <= budget:
            bb = cand
            break

    out = pl.pallas_call(
        _addcoords_kernel,
        out_shape=jax.ShapeDtypeStruct((b, c_out, xy), dtype),
        grid=(b // bb,),
        in_specs=[
            pl.BlockSpec((bb, c, xy), lambda i: (i, 0, 0)),
            # Constant block index -> fetched once, reused across all steps.
            pl.BlockSpec((1, n_coord, xy), lambda i: (0, 0, 0)),
        ],
        out_specs=pl.BlockSpec((bb, c_out, xy), lambda i: (i, 0, 0)),
        compiler_params=pltpu.CompilerParams(
            dimension_semantics=("parallel",)
        ),
    )(x_flat, coords)
    return out.reshape(b, c_out, xd, yd)


def addcoords_reference(x, with_r: bool = False):
    """Pure-JAX mirror of the PyTorch forward (source of truth for tests)."""
    b, c, xd, yd = x.shape
    xx = (jnp.arange(xd, dtype=jnp.float32) / (xd - 1)) * 2.0 - 1.0
    yy = (jnp.arange(yd, dtype=jnp.float32) / (yd - 1)) * 2.0 - 1.0
    xx_ch = jnp.broadcast_to(xx[None, None, :, None], (b, 1, xd, yd)).astype(x.dtype)
    yy_ch = jnp.broadcast_to(yy[None, None, None, :], (b, 1, xd, yd)).astype(x.dtype)
    parts = [x, xx_ch, yy_ch]
    if with_r:
        rr = jnp.sqrt((xx_ch - 0.5) ** 2 + (yy_ch - 0.5) ** 2)
        parts.append(rr)
    return jnp.concatenate(parts, axis=1)


if __name__ == "__main__":
    b, c, x_dim, y_dim = 2, 4, 16, 16
    key = jax.random.PRNGKey(0)
    x = jax.random.normal(key, (b, c, x_dim, y_dim), dtype=jnp.float32)

    # Default module config: with_r=False -> (B, C+2, X, Y)
    out = jax.block_until_ready(addcoords_forward(x, with_r=False))
    ref = addcoords_reference(x, with_r=False)
    assert out.shape == (b, c + 2, x_dim, y_dim), out.shape
    assert jnp.allclose(out, ref, atol=1e-6, rtol=1e-6), (
        float(jnp.max(jnp.abs(out - ref)))
    )

    # Also validate the with_r=True branch.
    out_r = jax.block_until_ready(addcoords_forward(x, with_r=True))
    ref_r = addcoords_reference(x, with_r=True)
    assert out_r.shape == (b, c + 3, x_dim, y_dim), out_r.shape
    assert jnp.allclose(out_r, ref_r, atol=1e-6, rtol=1e-6), (
        float(jnp.max(jnp.abs(out_r - ref_r)))
    )

    print("KERNEL_OK")
</pallas_src>

<mosaic_0001>
module attributes {stable_mosaic.version = 11 : i64} {
  func.func @_addcoords_kernel(%arg0: i32, %arg1: memref<2x4x256xf32, #tpu.memory_space<vmem>>, %arg2: memref<1x2x256xf32, #tpu.memory_space<vmem>>, %arg3: memref<2x6x256xf32, #tpu.memory_space<vmem>>) attributes {dimension_semantics = [#tpu.dimension_semantics<parallel>], iteration_bounds = array<i64: 1>, scalar_prefetch = 0 : i64, scratch_operands = 0 : i64, tpu.core_type = #tpu.core_type<tc>, window_params = [{transform_indices = @transform_0, window_bounds = array<i64: 2, 4, 256>}, {pipeline_mode = #tpu.pipeline_mode<synchronous>, transform_indices = @transform_1, window_bounds = array<i64: 1, 2, 256>}, {transform_indices = @transform_2, window_bounds = array<i64: 2, 6, 256>}]} {
    %c0 = arith.constant 0 : index
    %c0_0 = arith.constant 0 : index
    %c0_1 = arith.constant 0 : index
    %0 = vector.load %arg1[%c0, %c0_0, %c0_1] : memref<2x4x256xf32, #tpu.memory_space<vmem>>, vector<2x4x256xf32>
    %c0_2 = arith.constant 0 : index
    %c0_3 = arith.constant 0 : index
    %c0_4 = arith.constant 0 : index
    %1 = vector.load %arg3[%c0_2, %c0_3, %c0_4] : memref<2x6x256xf32, #tpu.memory_space<vmem>>, vector<2x4x256xf32>
    tpu.vector_store %arg3[%c0_2, %c0_3, %c0_4], %0 {strides = array<i32>} : memref<2x6x256xf32, #tpu.memory_space<vmem>>, vector<2x4x256xf32>,
    %c0_5 = arith.constant 0 : index
    %c0_6 = arith.constant 0 : index
    %c0_7 = arith.constant 0 : index
    %2 = vector.load %arg2[%c0_5, %c0_6, %c0_7] : memref<1x2x256xf32, #tpu.memory_space<vmem>>, vector<1x2x256xf32>
    %3 = vector.shape_cast %2 : vector<1x2x256xf32> to vector<1x2x256xf32>
    %4 = vector.broadcast %3 : vector<1x2x256xf32> to vector<2x2x256xf32>
    %c0_8 = arith.constant 0 : index
    %c4 = arith.constant 4 : index
    %c0_9 = arith.constant 0 : index
    %5 = vector.load %arg3[%c0_8, %c4, %c0_9] : memref<2x6x256xf32, #tpu.memory_space<vmem>>, vector<2x2x256xf32>
    tpu.vector_store %arg3[%c0_8, %c4, %c0_9], %4 {strides = array<i32>} : memref<2x6x256xf32, #tpu.memory_space<vmem>>, vector<2x2x256xf32>,
    return
  }
  func.func @transform_0(%arg0: i32) -> (i32, i32, i32) {
    %c0_i32 = arith.constant 0 : i32
    %c0_i32_0 = arith.constant 0 : i32
    %c0_i32_1 = arith.constant 0 : i32
    return %arg0, %c0_i32, %c0_i32_0 : i32, i32, i32
  }
  func.func @transform_1(%arg0: i32) -> (i32, i32, i32) {
    %c0_i32 = arith.constant 0 : i32
    %c0_i32_0 = arith.constant 0 : i32
    %c0_i32_1 = arith.constant 0 : i32
    %c0_i32_2 = arith.constant 0 : i32
    return %c0_i32, %c0_i32_0, %c0_i32_1 : i32, i32, i32
  }
  func.func @transform_2(%arg0: i32) -> (i32, i32, i32) {
    %c0_i32 = arith.constant 0 : i32
    %c0_i32_0 = arith.constant 0 : i32
    %c0_i32_1 = arith.constant 0 : i32
    return %arg0, %c0_i32, %c0_i32_0 : i32, i32, i32
  }
}

</mosaic_0001>

<bundles_post_ra>
// kernel: tpu_custom_call.1
= control target key start
LH: loop header
LB: loop body
LE: loop exit
PB: predicated region body
PF: predicated region fallthrough
CT: control target
= control target key end

     0   :  { %7 = vsyncpa [#allocation3], 0  ;;  %s193_s0 = inlined_call_operand.hbm [shape: f32[2,4,256], index: 0, kind: input, shape index: {}]   ;;  %s194_s1 = inlined_call_operand.hbm [shape: f32[1,2,256], index: 1, kind: input, shape index: {}]   ;;  %s195_s2 = inlined_call_operand.vmem [shape: f32[2,6,256], index: 2, kind: output, shape index: {}]  }
   0x1   :  { %8 = vsyncpa [#allocation5], 0  ;;  %s126_s9 = smov [#allocation2]   ;;  %s78_s13 = scalar_lea.hbm %s193_s0, 256 }
   0x2   :  { %s14_s10 = sshll.u32 %s126_s9, 4  ;;  %p79_p0 = scmp.ne.s32.totalorder %s193_s0, %s78_s13  ;;  %s15_s10 = int_to_ptr.vmem [resolvable:$true] %s14_s10 }
   0x3   :  { %p82_p1 = scmp.lt.u32.totalorder %s78_s13, %s193_s0 }
   0x5   :  { %p84_p2 = pnand %p82_p1, %p79_p0 }
   0x7   :  { %87 = shalt.err (!%p84_p2)
}
   0x8   :  { %s88_s18 = scalar_lea.vmem %s15_s10, 256  ;;  %p93_p4 = scmp.lt.s32.totalorder %s15_s10, %s15_s10 }
   0x9   :  { %p89_p3 = scmp.ne.s32.totalorder %s15_s10, %s88_s18  ;;  %p94_p5 = scmp.lt.s32.totalorder %s88_s18, %s88_s18 }
   0xb   :  { %p95_p6 = por %p94_p5, %p93_p4 }
   0xd   :  { %p96_p7 = pnand %p95_p6, %p89_p3 }
   0xf   :  { %99 = shalt.err (!%p96_p7)
}
  0x10   :  { %s127_s19 = smov 128   ;;  %s128_s20 = smov 8  }
  0x11   :  { %20 = dma.hbm_to_vmem [thread:$0]  %s193_s0, 256, %s15_s10, [#allocation3], %s127_s19, %s127_s19, %s128_s20  }
  0x12   :  { %s129_s23 = smov [#allocation4]   ;;  %s100_s27 = scalar_lea.hbm %s194_s1, 64 }
  0x13   :  { %s27_s24 = sshll.u32 %s129_s23, 4  ;;  %p101_p8 = scmp.ne.s32.totalorder %s194_s1, %s100_s27  ;;  %s28_s24 = int_to_ptr.vmem [resolvable:$true] %s27_s24 }
  0x14   :  { %p104_p9 = scmp.lt.u32.totalorder %s100_s27, %s194_s1 }
  0x16   :  { %p106_p10 = pnand %p104_p9, %p101_p8 }
  0x18   :  { %109 = shalt.err (!%p106_p10)
}
  0x19   :  { %s110_s4 = scalar_lea.vmem %s28_s24, 64  ;;  %p115_p12 = scmp.lt.s32.totalorder %s28_s24, %s28_s24 }
  0x1a   :  { %p111_p11 = scmp.ne.s32.totalorder %s28_s24, %s110_s4  ;;  %p116_p13 = scmp.lt.s32.totalorder %s110_s4, %s110_s4 }
  0x1c   :  { %p117_p0 = por %p116_p13, %p115_p12 }
  0x1e   :  { %p118_p1 = pnand %p117_p0, %p111_p11 }
  0x20   :  { %121 = shalt.err (!%p118_p1)
}
  0x21   :  { %30 = dma.hbm_to_vmem [thread:$0]  %s194_s1, 64, %s28_s24, [#allocation5]  }
  0x22   :  { %122 = dma.done.wait [#allocation3], 256  }
  0x23   :  { %123 = vsyncadd [#allocation3], 4294967040 }
  0x24   :  { %124 = dma.done.wait [#allocation5], 64  }
  0x25   :  { %125 = vsyncadd [#allocation5], 4294967232  ;;  %v37_v0 = vld [vmem:[#allocation2] sm:$0xff]  ;;  %v38_v1 = vld [vmem:[#allocation2 + $0x8] sm:$0xff] }
  0x26   :  { %v71_v2 = vld.sshfl [vmem:[#allocation4] sm:$0x33 pattern:$0x76325410]  ;;  %45 = vst [vmem:[%s195_s2] sm:$0xf] %v37_v0  ;;  %v41_v3 = vcombine.high %v37_v0, %v37_v0  ;;  %v42_v4 = vcombine.high %v38_v1, %v38_v1 }
  0x27   :  { %47 = vst [vmem:[%s195_s2 + $0x10] sm:$0xf] %v38_v1  ;;  %v58_v5 = vcombine.low %v71_v2, %v71_v2  ;;  %62 = vst [vmem:[%s195_s2 + $0x8] sm:$0x30] %v71_v2 }
  0x28   :  { %64 = vst [vmem:[%s195_s2 + $0x18] sm:$0x30] %v71_v2  ;;  %46 = vst [vmem:[%s195_s2 + $0x8] sm:$0xf] %v41_v3 }
  0x29   :  { %48 = vst [vmem:[%s195_s2 + $0x18] sm:$0xf] %v42_v4  ;;  %61 = vst [vmem:[%s195_s2] sm:$0x30] %v58_v5 }
  0x2a   :  { %63 = vst [vmem:[%s195_s2 + $0x10] sm:$0x30] %v58_v5 }
  0x2b   :  { %69 = vsyncpa [#allocation3], 1 }
  0x2c   :  { %70 = vsyncpa [#allocation5], 1 }

</bundles_post_ra>
